<compile_context>
chip_gen: v7x
topology: tpu7x:2x2x1
jax: 0.10.0
libtpu: 0.0.40
codegen_flags: <defaults>
</compile_context>

<pallas_src>
import numpy as np
import jax
import jax.numpy as jnp
from jax.experimental import pallas as pl
from jax.experimental.pallas import tpu as pltpu

D_MODEL = 32
N_HEAD = 4
D_HEAD = D_MODEL // N_HEAD
D_FF = 4 * D_MODEL
SEQ = 8
BATCH = 2
LN_EPS = 1e-5
M_ROWS = BATCH * SEQ            # batch folded into rows
HM_ROWS = N_HEAD * M_ROWS       # head-stacked attention rows


def _layer_norm(x, w, b):
    mu = jnp.mean(x, axis=-1, keepdims=True)
    var = jnp.mean((x - mu) ** 2, axis=-1, keepdims=True)
    return (x - mu) * jax.lax.rsqrt(var + LN_EPS) * w + b


def decoder_layer_kernel(x_ref, ln1w_ref, ln1b_ref, wqkv_ref, wo_ref, bo_ref,
                         ln2w_ref, ln2b_ref, w1_ref, b1_ref, w2_ref, b2_ref,
                         head_mask_ref, batch_bias_ref, o_ref):
    M, _ = x_ref.shape                      # M = B*S (batch folded into rows)

    x = x_ref[...].astype(jnp.float32)

    # ---- pre-LN + fused QKV projection (Wq already carries 1/sqrt(D_HEAD)) --
    h = _layer_norm(x, ln1w_ref[...], ln1b_ref[...])
    qkv = jnp.dot(h, wqkv_ref[...], preferred_element_type=jnp.float32)  # (M, 3D)
    q = qkv[:, 0:D_MODEL]
    k = qkv[:, D_MODEL:2 * D_MODEL]
    v = qkv[:, 2 * D_MODEL:3 * D_MODEL]

    # ---- all heads + all batch rows in one scores matmul / softmax / PV ----
    # Stacked row rho = head*M + (b*SEQ + s).  Head selection = precomputed 0/1
    # lane mask; batch isolation = precomputed additive block-diagonal bias.
    head_mask = head_mask_ref[...]                                    # (HM, D)
    q_stack = jnp.concatenate([q] * N_HEAD, axis=0) * head_mask       # (HM, D)

    scores = jax.lax.dot_general(                                     # (HM, M)
        q_stack, k, (((1,), (1,)), ((), ())),
        preferred_element_type=jnp.float32) + batch_bias_ref[...]

    smax = jnp.max(scores, axis=-1, keepdims=True)
    e = jnp.exp(scores - smax)
    denom = jnp.sum(e, axis=-1, keepdims=True)
    probs = e * pl.reciprocal(denom, approx=False)    # exact recip for 1e-4 tol

    pv = jnp.dot(probs, v, preferred_element_type=jnp.float32) * head_mask
    # Collapse the head stack back to (M, D): tile-aligned sublane slices + adds.
    a = pv[0:M]
    for hh in range(1, N_HEAD):
        a = a + pv[hh * M:(hh + 1) * M]

    # wo/bo carry the 2x residual: x1 = attn_out + dropout(attn_out)
    x1 = jnp.dot(a, wo_ref[...], preferred_element_type=jnp.float32) + bo_ref[...]

    # ---- pre-LN + MLP: Linear -> SiLU(1.702) -> Linear ----
    h2 = _layer_norm(x1, ln2w_ref[...], ln2b_ref[...])
    ff = jnp.dot(h2, w1_ref[...], preferred_element_type=jnp.float32) + b1_ref[...]
    ff = jax.nn.sigmoid(1.702 * ff) * ff
    # w2/b2 carry the final 2x residual: out = mlp_out + dropout(mlp_out)
    out = jnp.dot(ff, w2_ref[...], preferred_element_type=jnp.float32) + b2_ref[...]

    o_ref[...] = out.astype(o_ref.dtype)


def prepare_params(params):
    """One-time weight folding + mask construction (kept out of the hot path)."""
    scale = 1.0 / np.sqrt(np.float32(D_HEAD))
    wqkv = jnp.concatenate(
        [params["wq"] * scale, params["wk"], params["wv"]], axis=1)   # (D, 3D)
    wo2 = 2.0 * params["wo"]
    bo2 = 2.0 * params["bo"]
    w22 = 2.0 * params["w2"]
    b22 = 2.0 * params["b2"]

    rows = np.arange(HM_ROWS)
    lanes = np.arange(D_MODEL)
    head_mask = ((rows[:, None] // M_ROWS) ==
                 (lanes[None, :] // D_HEAD)).astype(np.float32)       # (HM, D)
    q_batch = (rows % M_ROWS) // SEQ
    k_batch = np.arange(M_ROWS) // SEQ
    batch_bias = np.where(q_batch[:, None] == k_batch[None, :],
                          0.0, -1e30).astype(np.float32)              # (HM, M)

    return (params["ln1_w"], params["ln1_b"], wqkv, wo2, bo2,
            params["ln2_w"], params["ln2_b"],
            params["w1"], params["b1"], w22, b22,
            jnp.asarray(head_mask), jnp.asarray(batch_bias))


@jax.jit
def transformer_decoder_layer(x, prepped):
    B, S, D = x.shape
    x2d = x.reshape(B * S, D)                              # free layout plumbing
    args = (x2d,) + tuple(prepped)
    vmem_spec = pl.BlockSpec(memory_space=pltpu.MemorySpace.VMEM)
    out2d = pl.pallas_call(
        decoder_layer_kernel,
        out_shape=jax.ShapeDtypeStruct((B * S, D), x.dtype),
        in_specs=[vmem_spec] * len(args),
        out_specs=vmem_spec,
    )(*args)
    return out2d.reshape(B, S, D)


def init_params(key):
    ks = jax.random.split(key, 10)
    std = 0.02
    return {
        "ln1_w": 1.0 + 0.1 * jax.random.normal(ks[0], (1, D_MODEL), jnp.float32),
        "ln1_b": 0.1 * jax.random.normal(ks[1], (1, D_MODEL), jnp.float32),
        "wq": std * jax.random.normal(ks[2], (D_MODEL, D_MODEL), jnp.float32),
        "wk": std * jax.random.normal(ks[3], (D_MODEL, D_MODEL), jnp.float32),
        "wv": std * jax.random.normal(ks[4], (D_MODEL, D_MODEL), jnp.float32),
        "wo": std * jax.random.normal(ks[5], (D_MODEL, D_MODEL), jnp.float32),
        "bo": jnp.zeros((1, D_MODEL), jnp.float32),
        "ln2_w": 1.0 + 0.1 * jax.random.normal(ks[6], (1, D_MODEL), jnp.float32),
        "ln2_b": 0.1 * jax.random.normal(ks[7], (1, D_MODEL), jnp.float32),
        "w1": std * jax.random.normal(ks[8], (D_MODEL, D_FF), jnp.float32),
        "b1": jnp.zeros((1, D_FF), jnp.float32),
        "w2": std * jax.random.normal(ks[9], (D_FF, D_MODEL), jnp.float32),
        "b2": jnp.zeros((1, D_MODEL), jnp.float32),
    }


def reference(x, params):
    """Pure-JAX reference mirroring the PyTorch forward (eval mode)."""
    def ln(t, w, b):
        mu = t.mean(-1, keepdims=True)
        var = ((t - mu) ** 2).mean(-1, keepdims=True)
        return (t - mu) / jnp.sqrt(var + LN_EPS) * w + b

    B, S, D = x.shape
    h = ln(x, params["ln1_w"][0], params["ln1_b"][0])
    q = h @ params["wq"]
    k = h @ params["wk"]
    v = h @ params["wv"]

    def split(t):
        return t.reshape(B, S, N_HEAD, D_HEAD).transpose(0, 2, 1, 3)

    qh, kh, vh = split(q), split(k), split(v)
    scores = jnp.einsum("bhqd,bhkd->bhqk", qh, kh) / jnp.sqrt(jnp.float32(D_HEAD))
    probs = jax.nn.softmax(scores, axis=-1)
    a = jnp.einsum("bhqk,bhkd->bhqd", probs, vh)
    a = a.transpose(0, 2, 1, 3).reshape(B, S, D)
    attn_out = a @ params["wo"] + params["bo"][0]
    x1 = attn_out + attn_out
    h2 = ln(x1, params["ln2_w"][0], params["ln2_b"][0])
    ff = h2 @ params["w1"] + params["b1"][0]
    ff = jax.nn.sigmoid(1.702 * ff) * ff
    m = ff @ params["w2"] + params["b2"][0]
    return m + m


if __name__ == "__main__":
    key = jax.random.PRNGKey(0)
    k_x, k_p = jax.random.split(key)
    x = jax.random.normal(k_x, (BATCH, SEQ, D_MODEL), jnp.float32)
    params = init_params(k_p)
    prepped = prepare_params(params)       # one-time weight folding + masks

    out = transformer_decoder_layer(x, prepped)
    out = jax.block_until_ready(out)

    ref = reference(x, params)
    assert out.shape == (BATCH, SEQ, D_MODEL)
    assert jnp.allclose(out, ref, atol=1e-4, rtol=1e-4), (
        float(jnp.max(jnp.abs(out - ref))))
    print("KERNEL_OK")
</pallas_src>

<mosaic_0001>
module attributes {stable_mosaic.version = 11 : i64} {
  func.func @decoder_layer_kernel(%arg0: memref<16x32xf32, #tpu.memory_space<vmem>>, %arg1: memref<1x32xf32, #tpu.memory_space<vmem>>, %arg2: memref<1x32xf32, #tpu.memory_space<vmem>>, %arg3: memref<32x96xf32, #tpu.memory_space<vmem>>, %arg4: memref<32x32xf32, #tpu.memory_space<vmem>>, %arg5: memref<1x32xf32, #tpu.memory_space<vmem>>, %arg6: memref<1x32xf32, #tpu.memory_space<vmem>>, %arg7: memref<1x32xf32, #tpu.memory_space<vmem>>, %arg8: memref<32x128xf32, #tpu.memory_space<vmem>>, %arg9: memref<1x128xf32, #tpu.memory_space<vmem>>, %arg10: memref<128x32xf32, #tpu.memory_space<vmem>>, %arg11: memref<1x32xf32, #tpu.memory_space<vmem>>, %arg12: memref<64x32xf32, #tpu.memory_space<vmem>>, %arg13: memref<64x16xf32, #tpu.memory_space<vmem>>, %arg14: memref<16x32xf32, #tpu.memory_space<vmem>>) attributes {dimension_semantics = [], scalar_prefetch = 0 : i64, scratch_operands = 0 : i64, tpu.core_type = #tpu.core_type<tc>} {
    %c0 = arith.constant 0 : index
    %c0_0 = arith.constant 0 : index
    %0 = vector.load %arg0[%c0, %c0_0] : memref<16x32xf32, #tpu.memory_space<vmem>>, vector<16x32xf32>
    %c0_1 = arith.constant 0 : index
    %c0_2 = arith.constant 0 : index
    %1 = vector.load %arg1[%c0_1, %c0_2] : memref<1x32xf32, #tpu.memory_space<vmem>>, vector<1x32xf32>
    %c0_3 = arith.constant 0 : index
    %c0_4 = arith.constant 0 : index
    %2 = vector.load %arg2[%c0_3, %c0_4] : memref<1x32xf32, #tpu.memory_space<vmem>>, vector<1x32xf32>
    %cst = arith.constant dense<0.000000e+00> : vector<16xf32>
    %3 = vector.multi_reduction <add>, %0, %cst [1] : vector<16x32xf32> to vector<16xf32>
    %4 = vector.shape_cast %3 : vector<16xf32> to vector<16x1xf32>
    %cst_5 = arith.constant 3.200000e+01 : f32
    %5 = vector.broadcast %cst_5 : f32 to vector<16x1xf32>
    %6 = arith.divf %4, %5 : vector<16x1xf32>
    %7 = vector.broadcast %6 : vector<16x1xf32> to vector<16x32xf32>
    %8 = arith.subf %0, %7 : vector<16x32xf32>
    %9 = arith.mulf %8, %8 : vector<16x32xf32>
    %cst_6 = arith.constant dense<0.000000e+00> : vector<16xf32>
    %10 = vector.multi_reduction <add>, %9, %cst_6 [1] : vector<16x32xf32> to vector<16xf32>
    %11 = vector.shape_cast %10 : vector<16xf32> to vector<16x1xf32>
    %cst_7 = arith.constant 3.200000e+01 : f32
    %12 = vector.broadcast %cst_7 : f32 to vector<16x1xf32>
    %13 = arith.divf %11, %12 : vector<16x1xf32>
    %14 = vector.broadcast %6 : vector<16x1xf32> to vector<16x32xf32>
    %15 = arith.subf %0, %14 : vector<16x32xf32>
    %cst_8 = arith.constant 9.99999974E-6 : f32
    %16 = vector.broadcast %cst_8 : f32 to vector<16x1xf32>
    %17 = arith.addf %13, %16 : vector<16x1xf32>
    %18 = math.rsqrt %17 : vector<16x1xf32>
    %19 = vector.broadcast %18 : vector<16x1xf32> to vector<16x32xf32>
    %20 = arith.mulf %15, %19 : vector<16x32xf32>
    %21 = vector.broadcast %1 : vector<1x32xf32> to vector<16x32xf32>
    %22 = arith.mulf %20, %21 : vector<16x32xf32>
    %23 = vector.broadcast %2 : vector<1x32xf32> to vector<16x32xf32>
    %24 = arith.addf %22, %23 : vector<16x32xf32>
    %c0_9 = arith.constant 0 : index
    %c0_10 = arith.constant 0 : index
    %25 = vector.load %arg3[%c0_9, %c0_10] : memref<32x96xf32, #tpu.memory_space<vmem>>, vector<32x96xf32>
    %cst_11 = arith.constant dense<0.000000e+00> : vector<16x96xf32>
    %26 = tpu.matmul %24, %25, %cst_11 {dimension_numbers = #tpu.dot_dimension_numbers<[1], [0], [0], [1], [0, 0, 1, 1], [], []>} : vector<16x32xf32>, vector<32x96xf32>, vector<16x96xf32> -> vector<16x96xf32>
    %27 = vector.extract_strided_slice %26 {offsets = [0, 0], sizes = [16, 32], strides = [1, 1]} : vector<16x96xf32> to vector<16x32xf32>
    %28 = vector.extract_strided_slice %26 {offsets = [0, 32], sizes = [16, 32], strides = [1, 1]} : vector<16x96xf32> to vector<16x32xf32>
    %29 = vector.extract_strided_slice %26 {offsets = [0, 64], sizes = [16, 32], strides = [1, 1]} : vector<16x96xf32> to vector<16x32xf32>
    %c0_12 = arith.constant 0 : index
    %c0_13 = arith.constant 0 : index
    %30 = vector.load %arg12[%c0_12, %c0_13] : memref<64x32xf32, #tpu.memory_space<vmem>>, vector<64x32xf32>
    %31 = tpu.concatenate %27, %27, %27, %27 in 0 : vector<16x32xf32>, vector<16x32xf32>, vector<16x32xf32>, vector<16x32xf32> -> vector<64x32xf32>
    %32 = arith.mulf %31, %30 : vector<64x32xf32>
    %cst_14 = arith.constant dense<0.000000e+00> : vector<64x16xf32>
    %33 = tpu.matmul %32, %28, %cst_14 {dimension_numbers = #tpu.dot_dimension_numbers<[1], [1], [0], [0], [0, 0, 1, 0], [], []>} : vector<64x32xf32>, vector<16x32xf32>, vector<64x16xf32> -> vector<64x16xf32>
    %c0_15 = arith.constant 0 : index
    %c0_16 = arith.constant 0 : index
    %34 = vector.load %arg13[%c0_15, %c0_16] : memref<64x16xf32, #tpu.memory_space<vmem>>, vector<64x16xf32>
    %35 = arith.addf %33, %34 : vector<64x16xf32>
    %cst_17 = arith.constant dense<0xFF800000> : vector<64xf32>
    %36 = vector.multi_reduction <maximumf>, %35, %cst_17 [1] : vector<64x16xf32> to vector<64xf32>
    %37 = vector.shape_cast %36 : vector<64xf32> to vector<64x1xf32>
    %38 = vector.broadcast %37 : vector<64x1xf32> to vector<64x16xf32>
    %39 = arith.subf %35, %38 : vector<64x16xf32>
    %40 = math.exp %39 : vector<64x16xf32>
    %cst_18 = arith.constant dense<0.000000e+00> : vector<64xf32>
    %41 = vector.multi_reduction <add>, %40, %cst_18 [1] : vector<64x16xf32> to vector<64xf32>
    %42 = vector.shape_cast %41 : vector<64xf32> to vector<64x1xf32>
    %43 = tpu.reciprocal %42 : vector<64x1xf32> -> vector<64x1xf32>
    %44 = vector.broadcast %43 : vector<64x1xf32> to vector<64x16xf32>
    %45 = arith.mulf %40, %44 : vector<64x16xf32>
    %cst_19 = arith.constant dense<0.000000e+00> : vector<64x32xf32>
    %46 = tpu.matmul %45, %29, %cst_19 {dimension_numbers = #tpu.dot_dimension_numbers<[1], [0], [0], [1], [0, 0, 1, 1], [], []>} : vector<64x16xf32>, vector<16x32xf32>, vector<64x32xf32> -> vector<64x32xf32>
    %47 = arith.mulf %46, %30 : vector<64x32xf32>
    %48 = vector.extract_strided_slice %47 {offsets = [0, 0], sizes = [16, 32], strides = [1, 1]} : vector<64x32xf32> to vector<16x32xf32>
    %49 = vector.extract_strided_slice %47 {offsets = [16, 0], sizes = [16, 32], strides = [1, 1]} : vector<64x32xf32> to vector<16x32xf32>
    %50 = arith.addf %48, %49 : vector<16x32xf32>
    %51 = vector.extract_strided_slice %47 {offsets = [32, 0], sizes = [16, 32], strides = [1, 1]} : vector<64x32xf32> to vector<16x32xf32>
    %52 = arith.addf %50, %51 : vector<16x32xf32>
    %53 = vector.extract_strided_slice %47 {offsets = [48, 0], sizes = [16, 32], strides = [1, 1]} : vector<64x32xf32> to vector<16x32xf32>
    %54 = arith.addf %52, %53 : vector<16x32xf32>
    %c0_20 = arith.constant 0 : index
    %c0_21 = arith.constant 0 : index
    %55 = vector.load %arg4[%c0_20, %c0_21] : memref<32x32xf32, #tpu.memory_space<vmem>>, vector<32x32xf32>
    %cst_22 = arith.constant dense<0.000000e+00> : vector<16x32xf32>
    %56 = tpu.matmul %54, %55, %cst_22 {dimension_numbers = #tpu.dot_dimension_numbers<[1], [0], [0], [1], [0, 0, 1, 1], [], []>} : vector<16x32xf32>, vector<32x32xf32>, vector<16x32xf32> -> vector<16x32xf32>
    %c0_23 = arith.constant 0 : index
    %c0_24 = arith.constant 0 : index
    %57 = vector.load %arg5[%c0_23, %c0_24] : memref<1x32xf32, #tpu.memory_space<vmem>>, vector<1x32xf32>
    %58 = vector.broadcast %57 : vector<1x32xf32> to vector<16x32xf32>
    %59 = arith.addf %56, %58 : vector<16x32xf32>
    %c0_25 = arith.constant 0 : index
    %c0_26 = arith.constant 0 : index
    %60 = vector.load %arg6[%c0_25, %c0_26] : memref<1x32xf32, #tpu.memory_space<vmem>>, vector<1x32xf32>
    %c0_27 = arith.constant 0 : index
    %c0_28 = arith.constant 0 : index
    %61 = vector.load %arg7[%c0_27, %c0_28] : memref<1x32xf32, #tpu.memory_space<vmem>>, vector<1x32xf32>
    %cst_29 = arith.constant dense<0.000000e+00> : vector<16xf32>
    %62 = vector.multi_reduction <add>, %59, %cst_29 [1] : vector<16x32xf32> to vector<16xf32>
    %63 = vector.shape_cast %62 : vector<16xf32> to vector<16x1xf32>
    %cst_30 = arith.constant 3.200000e+01 : f32
    %64 = vector.broadcast %cst_30 : f32 to vector<16x1xf32>
    %65 = arith.divf %63, %64 : vector<16x1xf32>
    %66 = vector.broadcast %65 : vector<16x1xf32> to vector<16x32xf32>
    %67 = arith.subf %59, %66 : vector<16x32xf32>
    %68 = arith.mulf %67, %67 : vector<16x32xf32>
    %cst_31 = arith.constant dense<0.000000e+00> : vector<16xf32>
    %69 = vector.multi_reduction <add>, %68, %cst_31 [1] : vector<16x32xf32> to vector<16xf32>
    %70 = vector.shape_cast %69 : vector<16xf32> to vector<16x1xf32>
    %cst_32 = arith.constant 3.200000e+01 : f32
    %71 = vector.broadcast %cst_32 : f32 to vector<16x1xf32>
    %72 = arith.divf %70, %71 : vector<16x1xf32>
    %73 = vector.broadcast %65 : vector<16x1xf32> to vector<16x32xf32>
    %74 = arith.subf %59, %73 : vector<16x32xf32>
    %cst_33 = arith.constant 9.99999974E-6 : f32
    %75 = vector.broadcast %cst_33 : f32 to vector<16x1xf32>
    %76 = arith.addf %72, %75 : vector<16x1xf32>
    %77 = math.rsqrt %76 : vector<16x1xf32>
    %78 = vector.broadcast %77 : vector<16x1xf32> to vector<16x32xf32>
    %79 = arith.mulf %74, %78 : vector<16x32xf32>
    %80 = vector.broadcast %60 : vector<1x32xf32> to vector<16x32xf32>
    %81 = arith.mulf %79, %80 : vector<16x32xf32>
    %82 = vector.broadcast %61 : vector<1x32xf32> to vector<16x32xf32>
    %83 = arith.addf %81, %82 : vector<16x32xf32>
    %c0_34 = arith.constant 0 : index
    %c0_35 = arith.constant 0 : index
    %84 = vector.load %arg8[%c0_34, %c0_35] : memref<32x128xf32, #tpu.memory_space<vmem>>, vector<32x128xf32>
    %cst_36 = arith.constant dense<0.000000e+00> : vector<16x128xf32>
    %85 = tpu.matmul %83, %84, %cst_36 {dimension_numbers = #tpu.dot_dimension_numbers<[1], [0], [0], [1], [0, 0, 1, 1], [], []>} : vector<16x32xf32>, vector<32x128xf32>, vector<16x128xf32> -> vector<16x128xf32>
    %c0_37 = arith.constant 0 : index
    %c0_38 = arith.constant 0 : index
    %86 = vector.load %arg9[%c0_37, %c0_38] : memref<1x128xf32, #tpu.memory_space<vmem>>, vector<1x128xf32>
    %87 = vector.broadcast %86 : vector<1x128xf32> to vector<16x128xf32>
    %88 = arith.addf %85, %87 : vector<16x128xf32>
    %cst_39 = arith.constant 1.702000e+00 : f32
    %89 = vector.broadcast %cst_39 : f32 to vector<16x128xf32>
    %90 = arith.mulf %89, %88 : vector<16x128xf32>
    %91 = arith.negf %90 : vector<16x128xf32>
    %92 = math.exp %91 : vector<16x128xf32>
    %cst_40 = arith.constant 1.000000e+00 : f32
    %93 = vector.broadcast %cst_40 : f32 to vector<16x128xf32>
    %94 = arith.addf %93, %92 : vector<16x128xf32>
    %95 = arith.divf %93, %94 : vector<16x128xf32>
    %96 = arith.mulf %95, %88 : vector<16x128xf32>
    %c0_41 = arith.constant 0 : index
    %c0_42 = arith.constant 0 : index
    %97 = vector.load %arg10[%c0_41, %c0_42] : memref<128x32xf32, #tpu.memory_space<vmem>>, vector<128x32xf32>
    %cst_43 = arith.constant dense<0.000000e+00> : vector<16x32xf32>
    %98 = tpu.matmul %96, %97, %cst_43 {dimension_numbers = #tpu.dot_dimension_numbers<[1], [0], [0], [1], [0, 0, 1, 1], [], []>} : vector<16x128xf32>, vector<128x32xf32>, vector<16x32xf32> -> vector<16x32xf32>
    %c0_44 = arith.constant 0 : index
    %c0_45 = arith.constant 0 : index
    %99 = vector.load %arg11[%c0_44, %c0_45] : memref<1x32xf32, #tpu.memory_space<vmem>>, vector<1x32xf32>
    %100 = vector.broadcast %99 : vector<1x32xf32> to vector<16x32xf32>
    %101 = arith.addf %98, %100 : vector<16x32xf32>
    %c0_46 = arith.constant 0 : index
    %c0_47 = arith.constant 0 : index
    %102 = vector.load %arg14[%c0_46, %c0_47] : memref<16x32xf32, #tpu.memory_space<vmem>>, vector<16x32xf32>
    tpu.vector_store %arg14[%c0_46, %c0_47], %101 {strides = array<i32>} : memref<16x32xf32, #tpu.memory_space<vmem>>, vector<16x32xf32>,
    return
  }
}

</mosaic_0001>

<bundles_post_ra>
// kernel: transformer_decoder_layer.1
= control target key start
LH: loop header
LB: loop body
LE: loop exit
PB: predicated region body
PF: predicated region fallthrough
CT: control target
= control target key end

     0   :  { %vm52_vm0 = vcmask 261120   ;;  %s1629_s0 = inlined_call_operand.vmem [shape: f32[16,32], index: 0, kind: input, shape index: {}]   ;;  %s1630_s1 = inlined_call_operand.vmem [shape: f32[1,32], index: 1, kind: input, shape index: {}]   ;;  %s1631_s2 = inlined_call_operand.vmem [shape: f32[1,32], index: 2, kind: input, shape index: {}]   ;;  %s1632_s3 = inlined_call_operand.vmem [shape: f32[32,96], index: 3, kind: input, shape index: {}]   ;;  %s1633_s4 = inlined_call_operand.vmem [shape: f32[32,32], index: 4, kind: input, shape index: {}]   ;;  %s1634_s5 = inlined_call_operand.vmem [shape: f32[1,32], index: 5, kind: input, shape index: {}]   ;;  %s1635_s6 = inlined_call_operand.vmem [shape: f32[1,32], index: 6, kind: input, shape index: {}]   ;;  %s1636_s7 = inlined_call_operand.vmem [shape: f32[1,32], index: 7, kind: input, shape index: {}]   ;;  %s1637_s8 = inlined_call_operand.vmem [shape: f32[32,128], index: 8, kind: input, shape index: {}]   ;;  %s1638_s9 = inlined_call_operand.vmem [shape: f32[1,128], index: 9, kind: input, shape index: {}]   ;;  %s1639_s10 = inlined_call_operand.vmem [shape: f32[128,32], index: 10, kind: input, shape index: {}]   ;;  %s1640_s11 = inlined_call_operand.vmem [shape: f32[1,32], index: 11, kind: input, shape index: {}]   ;;  %s1641_s12 = inlined_call_operand.vmem [shape: f32[64,32], index: 12, kind: input, shape index: {}]   ;;  %s1642_s13 = inlined_call_operand.vmem [shape: f32[64,16], index: 13, kind: input, shape index: {}]   ;;  %s1643_s14 = inlined_call_operand.hbm [shape: f32[16,32], index: 14, kind: output, shape index: {}]  }
   0x1   :  { %v48_v0 = vld [vmem:[%s1629_s0] sm:$0xff]  ;;  %v49_v1 = vld [vmem:[%s1629_s0 + $0x8] sm:$0xff] }
   0x2   :  { %19 = vsyncpa [#allocation3], 0  ;;  %v53_v2 = vsel %vm52_vm0, %v48_v0, 0.0  ;;  %v56_v3 = vsel %vm52_vm0, %v49_v1, 0.0  ;;  %v96_v14 = vld [vmem:[%s1632_s3] sm:$0xff]  ;;  %v97_v15 = vld [vmem:[%s1632_s3 + $0x8] sm:$0xff] }
   0x3   :  { %54 = vadd.xlane.f32.xlu0 %v53_v2  ;;  %v98_v16 = vld [vmem:[%s1632_s3 + $0x10] sm:$0xff]  ;;  %v1131_v17 = vpack.c.bf16 %v97_v15, %v96_v14  ;;  %v99_v18 = vld [vmem:[%s1632_s3 + $0x18] sm:$0xff]  ;;  %v942_v27 = vld [vmem:[%s1630_s1] ss:$0 sm:$0xff]  ;;  %s1284_s1 = smov 96   ;;  %vm344_vm2 = vcmask 130048  }
   0x4   :  { %v1135_v19 = vpack.c.bf16 %v99_v18, %v98_v16  ;;  %v943_v29 = vld [vmem:[%s1631_s2] ss:$0 sm:$0xff]  ;;  %vm1140_vm1 = vmpackc.low %vm52_vm0, %vm52_vm0  ;;  %v1409_v45 = vld [vmem:[%s1641_s12 + $0x8] sm:$0xff]  ;;  %s1286_s22 = smov [#allocation2]  }
   0x5   :  { %1132 = vmatprep.subr.bf16.mxu0 %v1131_v17  ;;  %v1397_v36 = vld [vmem:[%s1641_s12] sm:$0xff]  ;;  %v1414_v46 = vld [vmem:[%s1641_s12 + $0x10] sm:$0xff]  ;;  %v1421_v49 = vld [vmem:[%s1641_s12 + $0x18] sm:$0xff]  ;;  %s931_s23 = sshll.u32 %s1286_s22, 4  ;;  %s932_s23 = int_to_ptr.vmem [resolvable:$true] %s931_s23 }
   0x6   :  { %1134 = vmatpush3.bf16.msra.mxu0 %v1131_v17  ;;  %v1427_v50 = vld [vmem:[%s1641_s12 + $0x20] sm:$0xff]  ;;  %v1435_v53 = vld [vmem:[%s1641_s12 + $0x28] sm:$0xff]  ;;  %v1441_v54 = vld [vmem:[%s1641_s12 + $0x30] sm:$0xff]  ;;  %s1260_s24 = scalar_lea.vmem %s932_s23, 256  ;;  %p1265_p1 = scmp.lt.s32.totalorder %s932_s23, %s932_s23 }
   0x7   :  { %57 = vadd.xlane.f32.xlu0 %v56_v3  ;;  %1136 = vmatprep.subr.bf16.mxu0 %v1135_v19  ;;  %v1449_v57 = vld [vmem:[%s1641_s12 + $0x38] sm:$0xff]  ;;  %v198_v59 = vld [vmem:[%s1642_s13 + $0x8] sm:$0xff]  ;;  %v197_v61 = vld [vmem:[%s1642_s13] sm:$0xff]  ;;  %p1261_p0 = scmp.ne.s32.totalorder %s932_s23, %s1260_s24  ;;  %p1266_p2 = scmp.lt.s32.totalorder %s1260_s24, %s1260_s24 }
   0x8   :  { %v200_v2 = vld [vmem:[%s1642_s13 + $0x18] sm:$0xff] }
   0x9   :  { %p1267_p3 = por %p1266_p2, %p1265_p1 }
   0xa   :  { %1138 = vmatpush3.bf16.msra.mxu0 %v1135_v19  ;;  %v202_v19 = vld [vmem:[%s1642_s13 + $0x28] sm:$0xff] }
   0xb   :  { %p1268_p4 = pnand %p1267_p3, %p1261_p0 }
  0x90   :  { %v55_v4 = vpop.xlane.xlu0 %54 }
  0x91   :  { %v60_v5 = vmul.f32 0.03125, %v55_v4 }
  0x93   :  { %v62_v6 = vsub.f32 %v48_v0, %v60_v5 }
  0x94   :  { %v58_v7 = vpop.xlane.xlu0 %57 }
  0x95   :  { %v61_v8 = vmul.f32 0.03125, %v58_v7  ;;  %v64_v9 = vmul.f32 %v62_v6, %v62_v6  ;;  %v199_v7 = vld [vmem:[%s1642_s13 + $0x10] sm:$0xff] }
  0x97   :  { %v63_v10 = vsub.f32 %v49_v1, %v61_v8  ;;  %v66_v11 = vsel %vm52_vm0, %v64_v9, 0.0 }
  0x98   :  { %67 = vadd.xlane.f32.xlu1 %v66_v11 }
  0x99   :  { %v65_v12 = vmul.f32 %v63_v10, %v63_v10 }
  0x9b   :  { %v69_v13 = vsel %vm52_vm0, %v65_v12, 0.0  ;;  %v203_v12 = vld [vmem:[%s1642_s13 + $0x30] sm:$0xff] }
  0x9c   :  { %70 = vadd.xlane.f32.xlu1 %v69_v13  ;;  %v201_v13 = vld [vmem:[%s1642_s13 + $0x20] sm:$0xff] }
 0x125   :  { %v68_v20 = vpop.xlane.xlu1 %67 }
 0x126   :  { %v72_v21 = vmul.f32 0.03125, %v68_v20 }
 0x128   :  { %v74_v22 = vadd.f32 1e-05, %v72_v21 }
 0x129   :  { %v71_v23 = vpop.xlane.xlu1 %70 }
 0x12a   :  { %1212 = vrsqrt.f32 %v74_v22  ;;  %v73_v24 = vmul.f32 0.03125, %v71_v23  ;;  %v204_v23 = vld [vmem:[%s1642_s13 + $0x38] sm:$0xff]  ;;  %s1285_s13 = smov 64  }
 0x12c   :  { %v75_v25 = vadd.f32 1e-05, %v73_v24 }
 0x12e   :  { %1214 = vrsqrt.f32 %v75_v25 }
 0x134   :  { %v1213_v26 = vpop.eup %1212 }
 0x135   :  { %v78_v28 = vmul.f32 %v1213_v26, %v62_v6 }
 0x137   :  { %v86_v30 = vmul.f32 %v942_v27, %v78_v28 }
 0x138   :  { %v1215_v31 = vpop.eup %1214 }
 0x139   :  { %v79_v32 = vmul.f32 %v1215_v31, %v63_v10  ;;  %v94_v33 = vadd.f32 %v943_v29, %v86_v30 }
 0x13b   :  { %v87_v34 = vmul.f32 %v942_v27, %v79_v32  ;;  %1039 = vmatprep.mubr.msk.f32.mxu0 %vm52_vm0, %v94_v33 }
 0x13d   :  { %v95_v35 = vadd.f32 %v943_v29, %v87_v34 }
 0x13f   :  { %1040 = vmatmul.mubr.msk.f32.vlgmr.msra.gmra.mrb[0].mxu0 %vm52_vm0, %v95_v35 }
 0x212   :  { %v1041_v37 = vpop.f32.mrb[0].mxu0 }
 0x213   :  { %v172_v38 = vpop.f32.mrb[1].mxu0  ;;  %v190_v47 = vmul.f32 %v1041_v37, %v1409_v45  ;;  %v192_v51 = vmul.f32 %v1041_v37, %v1421_v49  ;;  %v194_v55 = vmul.f32 %v1041_v37, %v1435_v53  ;;  %v196_v58 = vmul.f32 %v1041_v37, %v1449_v57 }
 0x214   :  { %v1399_v39 = vpack.i.bf16 %v1041_v37, %v172_v38  ;;  %v189_v40 = vmul.f32 %v1397_v36, %v172_v38  ;;  %v191_v48 = vmul.f32 %v1414_v46, %v172_v38  ;;  %v193_v52 = vmul.f32 %v1427_v50, %v172_v38 }
 0x215   :  { %v195_v56 = vmul.f32 %v1441_v54, %v172_v38 }
 0x216   :  { %1203 = vrot.lane.b32.xlu0 %v1399_v39, %s1284_s1  ;;  %1046 = vmatprep.mubr.msk.f32.mxu1 %vm52_vm0, %v189_v40 }
 0x288   :  { %v1204_v41 = vpop.permute.xlu0 %1203 }
 0x289   :  { %v1206_v42 = vunpack.i.h.bf16 %v1204_v41  ;;  %v1205_v43 = vunpack.i.l.bf16 %v1204_v41 }
 0x28b   :  { %v1139_v44 = vpack.c.bf16 %v1206_v42, %v1205_v43 }
 0x28d   :  { %1141 = vmatprep.subr.msk.bf16.mxu1 %vm1140_vm1, %v1139_v44 }
 0x28e   :  { %1144 = vmatpush3.bf16.xpose.msk.msra.mxu1 %vm1140_vm1, %v1139_v44 }
 0x295   :  { %1047 = vmatmul.mubr.msk.f32.vlgmr.msra.gmra.mrb[0].mxu1 %vm52_vm0, %v190_v47 }
 0x296   :  { %1049 = vmatprep.mubr.msk.f32.mxu1 %vm52_vm0, %v191_v48 }
 0x299   :  { %1050 = vmatmul.mubr.msk.f32.gmra.mrb[2].mxu1 %vm52_vm0, %v192_v51 }
 0x29a   :  { %1052 = vmatprep.mubr.msk.f32.mxu1 %vm52_vm0, %v193_v52 }
 0x29d   :  { %1053 = vmatmul.mubr.msk.f32.gmra.mrb[4].mxu1 %vm52_vm0, %v194_v55 }
 0x29e   :  { %1055 = vmatprep.mubr.msk.f32.mxu1 %vm52_vm0, %v195_v56 }
 0x2a1   :  { %1056 = vmatmul.mubr.msk.f32.gmra.mrb[6].mxu1 %vm52_vm0, %v196_v58 }
 0x368   :  { %v1048_v60 = vpop.f32.mrb[0].mxu1 }
 0x369   :  { %v311_v62 = vadd.f32 %v1048_v60, %v198_v59  ;;  %v305_v63 = vpop.f32.mrb[1].mxu1 }
 0x36a   :  { %v306_v0 = vadd.f32 %v305_v63, %v197_v61 }
 0x36b   :  { %v348_v1 = vsel %vm344_vm2, %v311_v62, -inf }
 0x36c   :  { %349 = vmax.xlane.f32.xlu1 %v348_v1  ;;  %v1051_v3 = vpop.f32.mrb[2].mxu1  ;;  %v345_v6 = vsel %vm344_vm2, %v306_v0, -inf }
 0x36d   :  { %v315_v4 = vpop.f32.mrb[3].mxu1  ;;  %v321_v5 = vadd.f32 %v1051_v3, %v200_v2 }
 0x36e   :  { %v316_v10 = vadd.f32 %v315_v4, %v199_v7 }
 0x36f   :  { %v354_v11 = vsel %vm344_vm2, %v321_v5, -inf }
 0x370   :  { %v1054_v8 = vpop.f32.mrb[4].mxu1  ;;  %346 = vmax.xlane.f32.xlu1 %v345_v6  ;;  %v351_v18 = vsel %vm344_vm2, %v316_v10, -inf }
 0x371   :  { %v325_v9 = vpop.f32.mrb[5].mxu1  ;;  %v331_v21 = vadd.f32 %v1054_v8, %v202_v19 }
 0x372   :  { %v326_v17 = vadd.f32 %v325_v9, %v201_v13 }
 0x373   :  { %v360_v25 = vsel %vm344_vm2, %v331_v21, -inf }
 0x374   :  { %v1057_v14 = vpop.f32.mrb[6].mxu1  ;;  %355 = vmax.xlane.f32.xlu1 %v354_v11  ;;  %v357_v22 = vsel %vm344_vm2, %v326_v17, -inf }
 0x375   :  { %v335_v15 = vpop.f32.mrb[7].mxu1  ;;  %v341_v24 = vadd.f32 %v1057_v14, %v204_v23 }
 0x376   :  { %v336_v16 = vadd.f32 %v335_v15, %v203_v12 }
 0x377   :  { %v366_v26 = vsel %vm344_vm2, %v341_v24, -inf }
 0x378   :  { %352 = vmax.xlane.f32.xlu1 %v351_v18  ;;  %v363_v20 = vsel %vm344_vm2, %v336_v16, -inf }
 0x379   :  { %364 = vmax.xlane.f32.xlu0 %v363_v20 }
 0x37c   :  { %358 = vmax.xlane.f32.xlu1 %v357_v22 }
 0x380   :  { %361 = vmax.xlane.f32.xlu1 %v360_v25 }
 0x384   :  { %367 = vmax.xlane.f32.xlu1 %v366_v26 }
 0x3f9   :  { %v350_v27 = vpop.xlane.xlu1 %349 }
 0x3fa   :  { %v370_v28 = vsub.f32 %v311_v62, %v350_v27 }
 0x3fc   :  { %v379_v29 = vmul.f32 1.442695, %v370_v28 }
 0x3fd   :  { %v347_v30 = vpop.xlane.xlu1 %346 }
 0x3fe   :  { %1216 = vpow2.f32 %v379_v29  ;;  %v369_v31 = vsub.f32 %v306_v0, %v347_v30 }
 0x400   :  { %v377_v32 = vmul.f32 1.442695, %v369_v31 }
 0x401   :  { %v356_v33 = vpop.xlane.xlu1 %355 }
 0x402   :  { %1218 = vpow2.f32 %v377_v32  ;;  %v372_v34 = vsub.f32 %v321_v5, %v356_v33 }
 0x404   :  { %v383_v35 = vmul.f32 1.442695, %v372_v34 }
 0x405   :  { %v353_v37 = vpop.xlane.xlu1 %352 }
 0x406   :  { %1220 = vpow2.f32 %v383_v35  ;;  %v371_v38 = vsub.f32 %v316_v10, %v353_v37  ;;  %v365_v48 = vpop.xlane.xlu0 %364 }
 0x407   :  { %v375_v58 = vsub.f32 %v336_v16, %v365_v48 }
 0x408   :  { %v1487_v40 = vpop.eup %1216  ;;  %v381_v41 = vmul.f32 1.442695, %v371_v38 }
 0x409   :  { %v359_v42 = vpop.xlane.xlu1 %358  ;;  %v396_v43 = vsel %vm344_vm2, %v1487_v40, 0.0  ;;  %v389_v1 = vmul.f32 1.442695, %v375_v58 }
 0x40a   :  { %1222 = vpow2.f32 %v381_v41  ;;  %397 = vadd.xlane.f32.xlu1 %v396_v43  ;;  %v373_v47 = vsub.f32 %v326_v17, %v359_v42  ;;  %v582_v41 = vld [vmem:[%s1633_s4] sm:$0xff]  ;;  %v583_v42 = vld [vmem:[%s1633_s4 + $0x8] sm:$0xff] }
 0x40b   :  { %v1149_v43 = vpack.c.bf16 %v583_v42, %v582_v41 }
 0x40c   :  { %v1219_v44 = vpop.eup %1218  ;;  %v385_v59 = vmul.f32 1.442695, %v373_v47  ;;  %v585_v47 = vld [vmem:[%s1633_s4 + $0x18] sm:$0xff] }
 0x40d   :  { %v362_v51 = vpop.xlane.xlu1 %361  ;;  %v393_v52 = vsel %vm344_vm2, %v1219_v44, 0.0 }
 0x40e   :  { %v374_v55 = vsub.f32 %v331_v21, %v362_v51  ;;  %394 = vadd.xlane.f32.xlu1 %v393_v52 }
 0x410   :  { %v1492_v56 = vpop.eup %1220  ;;  %v387_v60 = vmul.f32 1.442695, %v374_v55 }
 0x411   :  { %v368_v61 = vpop.xlane.xlu1 %367  ;;  %v402_v62 = vsel %vm344_vm2, %v1492_v56, 0.0 }
 0x412   :  { %1224 = vpow2.f32 %v387_v60  ;;  %v376_v63 = vsub.f32 %v341_v24, %v368_v61  ;;  %403 = vadd.xlane.f32.xlu1 %v402_v62 }
 0x413   :  { %1226 = vpow2.f32 %v385_v59 }
 0x414   :  { %v1223_v0 = vpop.eup %1222  ;;  %v391_v2 = vmul.f32 1.442695, %v376_v63 }
 0x415   :  { %v399_v3 = vsel %vm344_vm2, %v1223_v0, 0.0 }
 0x416   :  { %1228 = vpow2.f32 %v391_v2  ;;  %400 = vadd.xlane.f32.xlu1 %v399_v3 }
 0x417   :  { %1230 = vpow2.f32 %v389_v1 }
 0x41c   :  { %v1225_v4 = vpop.eup %1224 }
 0x41d   :  { %v408_v5 = vsel %vm344_vm2, %v1225_v4, 0.0  ;;  %v1227_v6 = vpop.eup %1226 }
 0x41e   :  { %409 = vadd.xlane.f32.xlu1 %v408_v5  ;;  %v405_v8 = vsel %vm344_vm2, %v1227_v6, 0.0 }
 0x420   :  { %v1229_v7 = vpop.eup %1228 }
 0x421   :  { %v414_v9 = vsel %vm344_vm2, %v1229_v7, 0.0  ;;  %v1231_v10 = vpop.eup %1230 }
 0x422   :  { %406 = vadd.xlane.f32.xlu1 %v405_v8  ;;  %415 = vadd.xlane.f32.xlu0 %v414_v9  ;;  %v411_v11 = vsel %vm344_vm2, %v1231_v10, 0.0 }
 0x426   :  { %412 = vadd.xlane.f32.xlu1 %v411_v11 }
 0x437   :  { %1208 = vrot.lane.b32.xlu1 %v1399_v39, %s1285_s13 }
 0x497   :  { %v398_v12 = vpop.xlane.xlu1 %397 }
 0x49b   :  { %v395_v13 = vpop.xlane.xlu1 %394 }
 0x49c   :  { %1232 = vrcp.f32 %v395_v13 }
 0x49d   :  { %1234 = vrcp.f32 %v398_v12 }
 0x49f   :  { %v404_v14 = vpop.xlane.xlu1 %403 }
 0x4a3   :  { %v401_v16 = vpop.xlane.xlu1 %400 }
 0x4a4   :  { %1236 = vrcp.f32 %v401_v16 }
 0x4a5   :  { %1238 = vrcp.f32 %v404_v14 }
 0x4a6   :  { %v1233_v15 = vpop.eup %1232 }
 0x4a7   :  { %v425_v17 = vmul.f32 %v1233_v15, %v1219_v44  ;;  %v1235_v25 = vpop.eup %1234  ;;  %v584_v44 = vld [vmem:[%s1633_s4 + $0x10] sm:$0xff] }
 0x4a8   :  { %v426_v27 = vmul.f32 %v1235_v25, %v1487_v40  ;;  %v1153_v48 = vpack.c.bf16 %v585_v47, %v584_v44  ;;  %v826_v44 = vld [vmem:[%s1639_s10] sm:$0xff]  ;;  %v827_v47 = vld [vmem:[%s1639_s10 + $0x8] sm:$0xff] }
 0x4a9   :  { %1062 = vmatprep.mubr.msk.f32.mxu0 %vm344_vm2, %v425_v17 }
 0x4ab   :  { %v410_v18 = vpop.xlane.xlu1 %409 }
 0x4ae   :  { %v1237_v26 = vpop.eup %1236 }
 0x4af   :  { %v407_v19 = vpop.xlane.xlu1 %406  ;;  %v416_v39 = vpop.xlane.xlu0 %415  ;;  %v427_v29 = vmul.f32 %v1237_v26, %v1223_v0 }
 0x4b0   :  { %1240 = vrcp.f32 %v407_v19  ;;  %v1239_v28 = vpop.eup %1238 }
 0x4b1   :  { %1242 = vrcp.f32 %v410_v18  ;;  %v428_v31 = vmul.f32 %v1239_v28, %v1492_v56 }
 0x4b3   :  { %v413_v20 = vpop.xlane.xlu1 %412 }
 0x4b4   :  { %1244 = vrcp.f32 %v413_v20 }
 0x4b5   :  { %1246 = vrcp.f32 %v416_v39  ;;  %v720_v39 = vld [vmem:[%s1637_s8 + $0x10] sm:$0xff] }
 0x4b7   :  { %v1209_v21 = vpop.permute.xlu1 %1208 }
 0x4b8   :  { %v1211_v22 = vunpack.i.h.bf16 %v1209_v21  ;;  %v1210_v23 = vunpack.i.l.bf16 %v1209_v21  ;;  %v718_v21 = vld [vmem:[%s1637_s8] sm:$0xff] }
 0x4ba   :  { %v1145_v24 = vpack.c.bf16 %v1211_v22, %v1210_v23  ;;  %v1241_v30 = vpop.eup %1240  ;;  %v719_v22 = vld [vmem:[%s1637_s8 + $0x8] sm:$0xff] }
 0x4bb   :  { %v1243_v32 = vpop.eup %1242  ;;  %v429_v33 = vmul.f32 %v1241_v30, %v1227_v6  ;;  %v1157_v23 = vpack.c.bf16 %v719_v22, %v718_v21 }
 0x4bc   :  { %1146 = vmatprep.subr.bf16.mxu0 %v1145_v24  ;;  %v430_v35 = vmul.f32 %v1243_v32, %v1225_v4 }
 0x4bd   :  { %1148 = vmatpush3.bf16.msra.mxu0 %v1145_v24  ;;  %v721_v24 = vld [vmem:[%s1637_s8 + $0x18] sm:$0xff] }
 0x4be   :  { %v1245_v34 = vpop.eup %1244  ;;  %1150 = vmatprep.subr.bf16.mxu0 %v1149_v43  ;;  %v1161_v25 = vpack.c.bf16 %v721_v24, %v720_v39 }
 0x4bf   :  { %v1247_v37 = vpop.eup %1246  ;;  %v431_v38 = vmul.f32 %v1245_v34, %v1231_v10 }
 0x4c0   :  { %1063 = vmatmul.mubr.msk.f32.vlgmr.msra.gmra.mrb[2].mxu0 %vm344_vm2, %v426_v27  ;;  %v432_v40 = vmul.f32 %v1247_v37, %v1229_v7 }
 0x4c1   :  { %1065 = vmatprep.mubr.msk.f32.mxu0 %vm344_vm2, %v427_v29  ;;  %1152 = vmatpush3.bf16.msra.mxu0 %v1149_v43 }
 0x4c2   :  { %1154 = vmatprep.subr.bf16.mxu0 %v1153_v48 }
 0x4c4   :  { %1066 = vmatmul.mubr.msk.f32.gmra.mrb[4].mxu0 %vm344_vm2, %v428_v31 }
 0x4c5   :  { %1068 = vmatprep.mubr.msk.f32.mxu0 %vm344_vm2, %v429_v33  ;;  %1156 = vmatpush3.bf16.msra.mxu0 %v1153_v48  ;;  %v967_v33 = vld [vmem:[%s1635_s6] ss:$0 sm:$0xff]  ;;  %v1165_v48 = vpack.c.bf16 %v827_v47, %v826_v44 }
 0x4c6   :  { %1158 = vmatprep.subr.bf16.mxu0 %v1157_v23 }
 0x4c7   :  { %1166 = vmatprep.subr.bf16.mxu1 %v1165_v48 }
 0x4c8   :  { %1069 = vmatmul.mubr.msk.f32.gmra.mrb[6].mxu0 %vm344_vm2, %v430_v35  ;;  %v968_v35 = vld [vmem:[%s1636_s7] ss:$0 sm:$0xff]  ;;  %1168 = vmatpush3.bf16.msra.mxu1 %v1165_v48 }
 0x4c9   :  { %1071 = vmatprep.mubr.msk.f32.mxu0 %vm344_vm2, %v431_v38 }
 0x4cc   :  { %1072 = vmatmul.mubr.msk.f32.gmra.mrb[8].mxu0 %vm344_vm2, %v432_v40 }
 0x593   :  { %v1064_v51 = vpop.f32.mrb[2].mxu0 }
 0x594   :  { %v529_v52 = vpop.f32.mrb[3].mxu0  ;;  %v569_v56 = vmul.f32 %v1064_v51, %v1409_v45  ;;  %v828_v51 = vld [vmem:[%s1639_s10 + $0x10] sm:$0xff] }
 0x595   :  { %v568_v60 = vmul.f32 %v529_v52, %v1397_v36  ;;  %v829_v52 = vld [vmem:[%s1639_s10 + $0x18] sm:$0xff] }
 0x597   :  { %v1067_v55 = vpop.f32.mrb[4].mxu0 }
 0x598   :  { %v571_v58 = vmul.f32 %v1067_v55, %v1421_v49  ;;  %v539_v59 = vpop.f32.mrb[5].mxu0  ;;  %v1169_v55 = vpack.c.bf16 %v829_v52, %v828_v51 }
 0x599   :  { %v570_v61 = vmul.f32 %v539_v59, %v1414_v46  ;;  %v964_v46 = vld [vmem:[%s1634_s5] ss:$0 sm:$0xff] }
 0x59a   :  { %v577_v62 = vadd.f32 %v571_v58, %v569_v56  ;;  %1170 = vmatprep.subr.bf16.mxu1 %v1169_v55  ;;  %v830_v56 = vld [vmem:[%s1639_s10 + $0x20] sm:$0xff]  ;;  %v831_v58 = vld [vmem:[%s1639_s10 + $0x28] sm:$0xff] }
 0x59b   :  { %v576_v63 = vadd.f32 %v570_v61, %v568_v60  ;;  %v1070_v0 = vpop.f32.mrb[6].mxu0  ;;  %1172 = vmatpush3.bf16.msra.mxu1 %v1169_v55  ;;  %v1173_v59 = vpack.c.bf16 %v831_v58, %v830_v56  ;;  %v832_v60 = vld [vmem:[%s1639_s10 + $0x30] sm:$0xff]  ;;  %v833_v61 = vld [vmem:[%s1639_s10 + $0x38] sm:$0xff] }
 0x59c   :  { %v573_v1 = vmul.f32 %v1070_v0, %v1435_v53  ;;  %v549_v2 = vpop.f32.mrb[7].mxu0  ;;  %v835_v0 = vld [vmem:[%s1639_s10 + $0x48] sm:$0xff] }
 0x59d   :  { %v572_v3 = vmul.f32 %v549_v2, %v1427_v50  ;;  %1174 = vmatprep.subr.bf16.mxu1 %v1173_v59  ;;  %v836_v2 = vld [vmem:[%s1639_s10 + $0x50] sm:$0xff] }
 0x59e   :  { %v579_v4 = vadd.f32 %v577_v62, %v573_v1  ;;  %v1177_v62 = vpack.c.bf16 %v833_v61, %v832_v60 }
 0x59f   :  { %v578_v5 = vadd.f32 %v576_v63, %v572_v3  ;;  %v1073_v6 = vpop.f32.mrb[8].mxu0  ;;  %1176 = vmatpush3.bf16.msra.mxu1 %v1173_v59  ;;  %v834_v63 = vld [vmem:[%s1639_s10 + $0x40] sm:$0xff]  ;;  %v837_v3 = vld [vmem:[%s1639_s10 + $0x58] sm:$0xff] }
 0x5a0   :  { %v575_v45 = vmul.f32 %v1073_v6, %v1449_v57  ;;  %v559_v7 = vpop.f32.mrb[9].mxu0  ;;  %1178 = vmatprep.subr.bf16.mxu1 %v1177_v62  ;;  %v1181_v1 = vpack.c.bf16 %v835_v0, %v834_v63  ;;  %v839_v6 = vld [vmem:[%s1639_s10 + $0x68] sm:$0xff] }
 0x5a1   :  { %v574_v49 = vmul.f32 %v559_v7, %v1441_v54  ;;  %v840_v7 = vld [vmem:[%s1639_s10 + $0x70] sm:$0xff] }
 0x5a2   :  { %v581_v8 = vadd.f32 %v579_v4, %v575_v45  ;;  %v1185_v4 = vpack.c.bf16 %v837_v3, %v836_v2 }
 0x5a3   :  { %v580_v36 = vadd.f32 %v578_v5, %v574_v49  ;;  %1180 = vmatpush3.bf16.msra.mxu1 %v1177_v62  ;;  %v838_v5 = vld [vmem:[%s1639_s10 + $0x60] sm:$0xff]  ;;  %v841_v49 = vld [vmem:[%s1639_s10 + $0x78] sm:$0xff] }
 0x5a4   :  { %1182 = vmatprep.subr.bf16.mxu1 %v1181_v1  ;;  %v1189_v45 = vpack.c.bf16 %v839_v6, %v838_v5 }
 0x5a5   :  { %1082 = vmatprep.mubr.msk.f32.mxu0 %vm52_vm0, %v580_v36  ;;  %v969_v36 = vld [vmem:[%s1638_s9] ss:$0 sm:$0xff] }
 0x5a6   :  { %1083 = vmatmul.mubr.msk.f32.vlgmr.msra.gmra.mrb[10].mxu0 %vm52_vm0, %v581_v8  ;;  %v1193_v8 = vpack.c.bf16 %v841_v49, %v840_v7 }
 0x5a7   :  { %1160 = vmatpush3.bf16.msra.mxu0 %v1157_v23  ;;  %1184 = vmatpush3.bf16.msra.mxu1 %v1181_v1 }
 0x5a8   :  { %1162 = vmatprep.subr.bf16.mxu0 %v1161_v25  ;;  %1186 = vmatprep.subr.bf16.mxu1 %v1185_v4 }
 0x5ab   :  { %1164 = vmatpush3.bf16.msra.mxu0 %v1161_v25  ;;  %1188 = vmatpush3.bf16.msra.mxu1 %v1185_v4 }
 0x5ac   :  { %1190 = vmatprep.subr.bf16.mxu1 %v1189_v45 }
 0x5af   :  { %1192 = vmatpush3.bf16.msra.mxu1 %v1189_v45 }
 0x5b0   :  { %1194 = vmatprep.subr.bf16.mxu1 %v1193_v8 }
 0x5b3   :  { %1196 = vmatpush3.bf16.msra.mxu1 %v1193_v8 }
 0x679   :  { %v1084_v53 = vpop.f32.mrb[10].mxu0 }
 0x67a   :  { %v665_v50 = vpop.f32.mrb[11].mxu0  ;;  %v671_v10 = vadd.f32 %v1084_v53, %v964_v46 }
 0x67b   :  { %v666_v9 = vadd.f32 %v964_v46, %v665_v50 }
 0x67c   :  { %v679_v57 = vsel %vm52_vm0, %v671_v10, 0.0 }
 0x67d   :  { %v676_v11 = vsel %vm52_vm0, %v666_v9, 0.0 }
 0x67e   :  { %677 = vadd.xlane.f32.xlu0 %v676_v11 }
 0x682   :  { %680 = vadd.xlane.f32.xlu0 %v679_v57 }
 0x70b   :  { %v678_v54 = vpop.xlane.xlu0 %677 }
 0x70c   :  { %v682_v12 = vmul.f32 0.03125, %v678_v54 }
 0x70e   :  { %v684_v13 = vsub.f32 %v666_v9, %v682_v12 }
 0x70f   :  { %v681_v14 = vpop.xlane.xlu0 %680 }
 0x710   :  { %v683_v15 = vmul.f32 0.03125, %v681_v14  ;;  %v686_v16 = vmul.f32 %v684_v13, %v684_v13 }
 0x712   :  { %v685_v17 = vsub.f32 %v671_v10, %v683_v15  ;;  %v688_v18 = vsel %vm52_vm0, %v686_v16, 0.0 }
 0x713   :  { %689 = vadd.xlane.f32.xlu0 %v688_v18 }
 0x714   :  { %v687_v19 = vmul.f32 %v685_v17, %v685_v17 }
 0x716   :  { %v691_v20 = vsel %vm52_vm0, %v687_v19, 0.0 }
 0x717   :  { %692 = vadd.xlane.f32.xlu0 %v691_v20  ;;  %v974_v20 = vld [vmem:[%s1640_s11] ss:$0 sm:$0xff] }
 0x7a0   :  { %v690_v26 = vpop.xlane.xlu0 %689 }
 0x7a1   :  { %v694_v27 = vmul.f32 0.03125, %v690_v26 }
 0x7a3   :  { %v696_v28 = vadd.f32 1e-05, %v694_v27 }
 0x7a4   :  { %v693_v29 = vpop.xlane.xlu0 %692 }
 0x7a5   :  { %1248 = vrsqrt.f32 %v696_v28  ;;  %v695_v30 = vmul.f32 0.03125, %v693_v29 }
 0x7a7   :  { %v697_v31 = vadd.f32 1e-05, %v695_v30 }
 0x7a9   :  { %1250 = vrsqrt.f32 %v697_v31 }
 0x7af   :  { %v1249_v32 = vpop.eup %1248 }
 0x7b0   :  { %v700_v34 = vmul.f32 %v1249_v32, %v684_v13 }
 0x7b2   :  { %v708_v37 = vmul.f32 %v967_v33, %v700_v34 }
 0x7b3   :  { %v1251_v38 = vpop.eup %1250 }
 0x7b4   :  { %v701_v40 = vmul.f32 %v1251_v38, %v685_v17  ;;  %v716_v41 = vadd.f32 %v968_v35, %v708_v37 }
 0x7b6   :  { %v709_v42 = vmul.f32 %v967_v33, %v701_v40  ;;  %1093 = vmatprep.mubr.msk.f32.mxu0 %vm52_vm0, %v716_v41 }
 0x7b8   :  { %v717_v43 = vadd.f32 %v968_v35, %v709_v42 }
 0x7ba   :  { %1094 = vmatmul.mubr.msk.f32.vlgmr.msra.gmra.mrb[12].mxu0 %vm52_vm0, %v717_v43 }
 0x88d   :  { %v1095_v46 = vpop.f32.mrb[12].mxu0 }
 0x88e   :  { %v807_v53 = vadd.f32 %v1095_v46, %v969_v36  ;;  %v801_v50 = vpop.f32.mrb[13].mxu0 }
 0x88f   :  { %v802_v9 = vadd.f32 %v969_v36, %v801_v50 }
 0x890   :  { %v973_v10 = vmul.f32 -1.702, %v807_v53 }
 0x891   :  { %v972_v11 = vmul.f32 -1.702, %v802_v9 }
 0x892   :  { %v816_v57 = vmul.f32 1.442695, %v973_v10 }
 0x893   :  { %v814_v54 = vmul.f32 1.442695, %v972_v11 }
 0x894   :  { %1252 = vpow2.f32 %v816_v57 }
 0x895   :  { %1254 = vpow2.f32 %v814_v54 }
 0x89e   :  { %v1253_v12 = vpop.eup %1252 }
 0x89f   :  { %v1255_v13 = vpop.eup %1254  ;;  %v819_v14 = vadd.f32 1.0, %v1253_v12 }
 0x8a0   :  { %v818_v15 = vadd.f32 1.0, %v1255_v13 }
 0x8a1   :  { %1256 = vrcp.f32 %v819_v14 }
 0x8a2   :  { %1258 = vrcp.f32 %v818_v15 }
 0x8ab   :  { %v1257_v16 = vpop.eup %1256 }
 0x8ac   :  { %v1259_v17 = vpop.eup %1258  ;;  %v825_v19 = vmul.f32 %v1257_v16, %v807_v53 }
 0x8ad   :  { %v824_v18 = vmul.f32 %v1259_v17, %v802_v9 }
 0x8af   :  { %1128 = vmatprep.mubr.f32.mxu1 %v824_v18 }
 0x8b0   :  { %1129 = vmatmul.mubr.f32.vlgmr.msra.gmra.mrb[8].mxu1 %v825_v19 }
 0x983   :  { %v1130_v21 = vpop.f32.mrb[8].mxu1 }
 0x984   :  { %v921_v22 = vadd.f32 %v1130_v21, %v974_v20  ;;  %v915_v23 = vpop.f32.mrb[9].mxu1 }
 0x985   :  { %v916_v39 = vadd.f32 %v974_v20, %v915_v23 }
 0x986   :  { %925 = vst.msk [vmem:[#allocation2 + $0x8] sm:$0xff] %vm52_vm0, %v921_v22 }
 0x987   :  { %924 = vst.msk [vmem:[#allocation2] sm:$0xff] %vm52_vm0, %v916_v39 }
 0x988   :  { %1271 = shalt.err (!%p1268_p4)
}
 0x989   :  { %s1272_s3 = scalar_lea.hbm %s1643_s14, 256 }
 0x98a   :  { %p1273_p5 = scmp.ne.s32.totalorder %s1643_s14, %s1272_s3  ;;  %p1276_p6 = scmp.lt.u32.totalorder %s1272_s3, %s1643_s14 }
 0x98c   :  { %p1278_p7 = pnand %p1276_p6, %p1273_p5 }
 0x98e   :  { %1281 = shalt.err (!%p1278_p7)
}
 0x98f   :  { %s1287_s12 = smov 128   ;;  %s1288_s28 = smov 8  }
 0x990   :  { %937 = dma.vmem_to_hbm [thread:$0]  %s932_s23, 256, %s1643_s14, [#allocation3], %s1287_s12, %s1287_s12, %s1288_s28  }
 0x991   :  { %1282 = dma.done.wait [#allocation3], 256  }
 0x992   :  { %1283 = vsyncadd [#allocation3], 4294967040 }
 0x993   :  { %941 = vsyncpa [#allocation3], 1 }

</bundles_post_ra>
